<compile_context>
chip_gen: v7x
topology: tpu7x:2x2x1
jax: 0.10.0
libtpu: 0.0.40
codegen_flags: <defaults>
</compile_context>

<pallas_src>
import jax
import jax.numpy as jnp
from jax import lax
from jax.experimental import pallas as pl
from jax.experimental.pallas import tpu as pltpu

K = 5          # depthwise kernel size
PAD = K // 2   # spatial padding on each side


def _make_kernel(H, W, C, fused):
    """Kernel factory (H, W, C and the fused/tap choice are trace-time static)."""
    HW = H * W

    def kernel(x_ref, w_ref, b_ref, o_ref, *scratch):
        # x_ref : (1, C, HW)   image: channels on sublanes, flattened spatial on lanes
        # w_ref : fused -> (Cout, K*K*C)   |  tap -> (K*K, Cout, C)
        # b_ref : (Cout, 1) float32 (depthwise bias already folded in)
        # o_ref : (1, Cout, HW)  lane-dense output
        x = x_ref[0]                                   # (C, HW)

        lane = lax.broadcasted_iota(jnp.int32, (C, HW), 1)
        if (W & (W - 1)) == 0:                         # avoid vector div/rem when possible
            col_idx = lane & (W - 1)
            row_idx = lane >> (W.bit_length() - 1)
        else:
            col_idx = lane % W
            row_idx = lane // W

        def tap(dh, dw):
            """tap(dh,dw)[c, h*W+w] == x[c, h+dh, w+dw] (0 outside the image)."""
            s = dh * W + dw
            shift = (-s) % HW
            v = x if shift == 0 else pltpu.roll(x, shift=shift, axis=1)
            m = None
            if dw != 0:
                m = (col_idx >= -dw) if dw < 0 else (col_idx < W - dw)
            if dh != 0:
                vm = (row_idx >= -dh) if dh < 0 else (row_idx < H - dh)
                m = vm if m is None else (m & vm)
            if m is not None:
                v = jnp.where(m, v, jnp.zeros_like(v))
            return v

        if fused:
            # Small C: build the contraction-major im2col buffer (HW stays on
            # lanes -> full-width stores) and do ONE MXU matmul with K = 25*C.
            (col_ref,) = scratch
            for kh in range(K):
                for kw in range(K):
                    t = kh * K + kw
                    col_ref[t * C:(t + 1) * C, :] = tap(kh - PAD, kw - PAD)
            y = lax.dot_general(
                w_ref[...], col_ref[...],
                dimension_numbers=(((1,), (0,)), ((), ())),
                preferred_element_type=jnp.float32)
        else:
            # Large C: tap-accumulated matmuls; no 25x buffer, no 25x MXU FLOPs.
            y = None
            for kh in range(K):
                for kw in range(K):
                    t = kh * K + kw
                    part = lax.dot_general(
                        w_ref[t], tap(kh - PAD, kw - PAD),
                        dimension_numbers=(((1,), (0,)), ((), ())),
                        preferred_element_type=jnp.float32)
                    y = part if y is None else y + part

        o_ref[0] = (y + b_ref[...]).astype(o_ref.dtype)

    return kernel


def _vmem_limit_bytes(per_step_bytes):
    limit = max(32 * 1024 * 1024, 4 * per_step_bytes)  # room for double-buffering
    try:
        cap = pltpu.get_tpu_info().vmem_capacity_bytes
        limit = min(limit, (3 * cap) // 4)              # headroom on v7x's 64 MiB
    except Exception:
        limit = min(limit, 96 * 1024 * 1024)
    return int(limit)


def depthwise_separable_conv5(x_nchw, dw_w, dw_b, pw_w, pw_b, *, fuse_k_limit=256):
    """Forward pass of DepthwiseSeparableConv5 as one fused Pallas kernel.

    x_nchw: (N, C, H, W); dw_w: (C, 1, 5, 5); dw_b: (C,);
    pw_w: (Cout, C, 1, 1); pw_b: (Cout,).  Returns (N, Cout, H, W).
    """
    N, C, H, W = x_nchw.shape
    Cout = pw_w.shape[0]
    HW = H * W
    fused = (K * K * C) <= fuse_k_limit   # keep the single matmul only while 25*C
                                          # fits ~one MXU K tile (use ~128 on v5e)

    # NCHW -> (N, C, H*W) is a contiguous reshape: no HBM transpose.
    x_flat = x_nchw.reshape(N, C, HW)
    compute_dtype = x_nchw.dtype

    # Fold depthwise into pointwise (exactly, once, in f32):
    #   w_tap[t, co, c] = pw[co, c] * dw[c, kh, kw],  t = kh*K + kw
    #   b_eff[co]       = pw_b[co] + sum_c pw[co, c] * dw_b[c]
    dw = dw_w[:, 0, :, :].astype(jnp.float32)                        # (C, K, K)
    pw = pw_w[:, :, 0, 0].astype(jnp.float32)                        # (Cout, C)
    dw_t = jnp.transpose(dw, (1, 2, 0)).reshape(K * K, 1, C)          # (K*K, 1, C)
    w_tap = pw[None, :, :] * dw_t                                     # (K*K, Cout, C)
    b_eff = (pw_b.astype(jnp.float32)
             + pw @ dw_b.astype(jnp.float32)).reshape(Cout, 1)

    itemsize = jnp.dtype(compute_dtype).itemsize
    if fused:
        w_arg = jnp.transpose(w_tap, (1, 0, 2)).reshape(Cout, K * K * C)
        w_arg = w_arg.astype(compute_dtype)                           # cast once here
        w_spec = pl.BlockSpec((Cout, K * K * C), lambda n: (0, 0))
        scratch = [pltpu.VMEM((K * K * C, HW), compute_dtype)]        # input-dtype scratch
        col_bytes = K * K * C * HW * itemsize
    else:
        w_arg = w_tap.astype(compute_dtype)                           # (K*K, Cout, C)
        w_spec = pl.BlockSpec((K * K, Cout, C), lambda n: (0, 0, 0))
        scratch = []
        col_bytes = 0

    per_step = (C * HW + Cout * HW + w_arg.size) * itemsize + col_bytes

    out_flat = pl.pallas_call(
        _make_kernel(H, W, C, fused),
        out_shape=jax.ShapeDtypeStruct((N, Cout, HW), x_nchw.dtype),
        grid_spec=pltpu.PrefetchScalarGridSpec(
            num_scalar_prefetch=0,
            grid=(N,),
            in_specs=[
                pl.BlockSpec((1, C, HW), lambda n: (n, 0, 0)),
                w_spec,
                pl.BlockSpec((Cout, 1), lambda n: (0, 0)),
            ],
            out_specs=pl.BlockSpec((1, Cout, HW), lambda n: (n, 0, 0)),
            scratch_shapes=scratch,
        ),
        compiler_params=pltpu.CompilerParams(
            dimension_semantics=("parallel",),
            vmem_limit_bytes=_vmem_limit_bytes(per_step),
        ),
    )(x_flat, w_arg, b_eff)

    # Free reshape (no transpose): (N, Cout, H*W) -> (N, Cout, H, W) == NCHW.
    return out_flat.reshape(N, Cout, H, W)


def _reference(x_nchw, dw_w, dw_b, pw_w, pw_b):
    C = x_nchw.shape[1]
    y = lax.conv_general_dilated(
        x_nchw, dw_w, window_strides=(1, 1), padding=((PAD, PAD), (PAD, PAD)),
        dimension_numbers=("NCHW", "OIHW", "NCHW"), feature_group_count=C)
    y = y + dw_b.reshape(1, -1, 1, 1)
    z = lax.conv_general_dilated(
        y, pw_w, window_strides=(1, 1), padding=((0, 0), (0, 0)),
        dimension_numbers=("NCHW", "OIHW", "NCHW"))
    return z + pw_b.reshape(1, -1, 1, 1)


if __name__ == "__main__":
    def _run_case(N, C_in, C_out, H, W):
        key = jax.random.PRNGKey(0)
        k_x, k_dww, k_dwb, k_pww, k_pwb = jax.random.split(key, 5)
        x = jax.random.normal(k_x, (N, C_in, H, W), jnp.float32)
        dw_w = 0.1 * jax.random.normal(k_dww, (C_in, 1, K, K), jnp.float32)
        dw_b = 0.1 * jax.random.normal(k_dwb, (C_in,), jnp.float32)
        pw_w = 0.1 * jax.random.normal(k_pww, (C_out, C_in, 1, 1), jnp.float32)
        pw_b = 0.1 * jax.random.normal(k_pwb, (C_out,), jnp.float32)

        out = jax.block_until_ready(
            depthwise_separable_conv5(x, dw_w, dw_b, pw_w, pw_b))
        ref = _reference(x, dw_w, dw_b, pw_w, pw_b)
        assert out.shape == (N, C_out, H, W)
        assert jnp.allclose(out, ref, atol=2e-4, rtol=2e-4), "mismatch vs reference"

    # Small-C case (25*C <= 256): single fused im2col matmul path.
    _run_case(N=2, C_in=4, C_out=8, H=16, W=16)
    # Larger-C case (25*C > 256): tap-accumulated matmul path.
    _run_case(N=2, C_in=32, C_out=8, H=16, W=16)

    print("KERNEL_OK")
</pallas_src>

<mosaic_0001>
module attributes {stable_mosaic.version = 11 : i64} {
  func.func @kernel(%arg0: i32, %arg1: memref<1x4x256xf32, #tpu.memory_space<vmem>>, %arg2: memref<8x100xf32, #tpu.memory_space<vmem>>, %arg3: memref<8x1xf32, #tpu.memory_space<vmem>>, %arg4: memref<1x8x256xf32, #tpu.memory_space<vmem>>, %arg5: memref<100x256xf32, #tpu.memory_space<vmem>>) attributes {dimension_semantics = [#tpu.dimension_semantics<parallel>], iteration_bounds = array<i64: 2>, scalar_prefetch = 0 : i64, scratch_operands = 1 : i64, tpu.core_type = #tpu.core_type<tc>, window_params = [{transform_indices = @transform_0, window_bounds = array<i64: 1, 4, 256>}, {pipeline_mode = #tpu.pipeline_mode<synchronous>, transform_indices = @transform_1, window_bounds = array<i64: 8, 100>}, {pipeline_mode = #tpu.pipeline_mode<synchronous>, transform_indices = @transform_2, window_bounds = array<i64: 8, 1>}, {transform_indices = @transform_3, window_bounds = array<i64: 1, 8, 256>}]} {
    %c0 = arith.constant 0 : index
    %c0_0 = arith.constant 0 : index
    %c0_1 = arith.constant 0 : index
    %0 = vector.load %arg1[%c0, %c0_0, %c0_1] : memref<1x4x256xf32, #tpu.memory_space<vmem>>, vector<1x4x256xf32>
    %1 = vector.shape_cast %0 : vector<1x4x256xf32> to vector<4x256xf32>
    %2 = tpu.iota {dimensions = array<i32: 1>} : vector<4x256xi32>
    %c15_i32 = arith.constant 15 : i32
    %3 = vector.broadcast %c15_i32 : i32 to vector<4x256xi32>
    %4 = arith.andi %2, %3 : vector<4x256xi32>
    %c4_i32 = arith.constant 4 : i32
    %5 = vector.broadcast %c4_i32 : i32 to vector<4x256xi32>
    %6 = arith.shrsi %2, %5 : vector<4x256xi32>
    %c34_i32 = arith.constant 34 : i32
    %7 = tpu.dynamic_rotate %1 by %c34_i32 dim 1 : vector<4x256xf32>, i32 -> vector<4x256xf32>
    %c2_i32 = arith.constant 2 : i32
    %8 = vector.broadcast %c2_i32 : i32 to vector<4x256xi32>
    %9 = arith.cmpi sge, %4, %8 : vector<4x256xi32>
    %c2_i32_2 = arith.constant 2 : i32
    %10 = vector.broadcast %c2_i32_2 : i32 to vector<4x256xi32>
    %11 = arith.cmpi sge, %6, %10 : vector<4x256xi32>
    %12 = arith.andi %9, %11 : vector<4x256xi1>
    %cst = arith.constant 0.000000e+00 : f32
    %13 = vector.broadcast %cst : f32 to vector<4x256xf32>
    %14 = arith.select %12, %7, %13 : vector<4x256xi1>, vector<4x256xf32>
    %c0_3 = arith.constant 0 : index
    %c0_4 = arith.constant 0 : index
    %15 = vector.load %arg5[%c0_3, %c0_4] : memref<100x256xf32, #tpu.memory_space<vmem>>, vector<4x256xf32>
    tpu.vector_store %arg5[%c0_3, %c0_4], %14 {strides = array<i32>} : memref<100x256xf32, #tpu.memory_space<vmem>>, vector<4x256xf32>,
    %c33_i32 = arith.constant 33 : i32
    %16 = tpu.dynamic_rotate %1 by %c33_i32 dim 1 : vector<4x256xf32>, i32 -> vector<4x256xf32>
    %c1_i32 = arith.constant 1 : i32
    %17 = vector.broadcast %c1_i32 : i32 to vector<4x256xi32>
    %18 = arith.cmpi sge, %4, %17 : vector<4x256xi32>
    %c2_i32_5 = arith.constant 2 : i32
    %19 = vector.broadcast %c2_i32_5 : i32 to vector<4x256xi32>
    %20 = arith.cmpi sge, %6, %19 : vector<4x256xi32>
    %21 = arith.andi %18, %20 : vector<4x256xi1>
    %cst_6 = arith.constant 0.000000e+00 : f32
    %22 = vector.broadcast %cst_6 : f32 to vector<4x256xf32>
    %23 = arith.select %21, %16, %22 : vector<4x256xi1>, vector<4x256xf32>
    %c4 = arith.constant 4 : index
    %c0_7 = arith.constant 0 : index
    %24 = vector.load %arg5[%c4, %c0_7] : memref<100x256xf32, #tpu.memory_space<vmem>>, vector<4x256xf32>
    tpu.vector_store %arg5[%c4, %c0_7], %23 {strides = array<i32>} : memref<100x256xf32, #tpu.memory_space<vmem>>, vector<4x256xf32>,
    %c32_i32 = arith.constant 32 : i32
    %25 = tpu.dynamic_rotate %1 by %c32_i32 dim 1 : vector<4x256xf32>, i32 -> vector<4x256xf32>
    %c2_i32_8 = arith.constant 2 : i32
    %26 = vector.broadcast %c2_i32_8 : i32 to vector<4x256xi32>
    %27 = arith.cmpi sge, %6, %26 : vector<4x256xi32>
    %cst_9 = arith.constant 0.000000e+00 : f32
    %28 = vector.broadcast %cst_9 : f32 to vector<4x256xf32>
    %29 = arith.select %27, %25, %28 : vector<4x256xi1>, vector<4x256xf32>
    %c8 = arith.constant 8 : index
    %c0_10 = arith.constant 0 : index
    %30 = vector.load %arg5[%c8, %c0_10] : memref<100x256xf32, #tpu.memory_space<vmem>>, vector<4x256xf32>
    tpu.vector_store %arg5[%c8, %c0_10], %29 {strides = array<i32>} : memref<100x256xf32, #tpu.memory_space<vmem>>, vector<4x256xf32>,
    %c31_i32 = arith.constant 31 : i32
    %31 = tpu.dynamic_rotate %1 by %c31_i32 dim 1 : vector<4x256xf32>, i32 -> vector<4x256xf32>
    %c15_i32_11 = arith.constant 15 : i32
    %32 = vector.broadcast %c15_i32_11 : i32 to vector<4x256xi32>
    %33 = arith.cmpi slt, %4, %32 : vector<4x256xi32>
    %c2_i32_12 = arith.constant 2 : i32
    %34 = vector.broadcast %c2_i32_12 : i32 to vector<4x256xi32>
    %35 = arith.cmpi sge, %6, %34 : vector<4x256xi32>
    %36 = arith.andi %33, %35 : vector<4x256xi1>
    %cst_13 = arith.constant 0.000000e+00 : f32
    %37 = vector.broadcast %cst_13 : f32 to vector<4x256xf32>
    %38 = arith.select %36, %31, %37 : vector<4x256xi1>, vector<4x256xf32>
    %c12 = arith.constant 12 : index
    %c0_14 = arith.constant 0 : index
    %39 = vector.load %arg5[%c12, %c0_14] : memref<100x256xf32, #tpu.memory_space<vmem>>, vector<4x256xf32>
    tpu.vector_store %arg5[%c12, %c0_14], %38 {strides = array<i32>} : memref<100x256xf32, #tpu.memory_space<vmem>>, vector<4x256xf32>,
    %c30_i32 = arith.constant 30 : i32
    %40 = tpu.dynamic_rotate %1 by %c30_i32 dim 1 : vector<4x256xf32>, i32 -> vector<4x256xf32>
    %c14_i32 = arith.constant 14 : i32
    %41 = vector.broadcast %c14_i32 : i32 to vector<4x256xi32>
    %42 = arith.cmpi slt, %4, %41 : vector<4x256xi32>
    %c2_i32_15 = arith.constant 2 : i32
    %43 = vector.broadcast %c2_i32_15 : i32 to vector<4x256xi32>
    %44 = arith.cmpi sge, %6, %43 : vector<4x256xi32>
    %45 = arith.andi %42, %44 : vector<4x256xi1>
    %cst_16 = arith.constant 0.000000e+00 : f32
    %46 = vector.broadcast %cst_16 : f32 to vector<4x256xf32>
    %47 = arith.select %45, %40, %46 : vector<4x256xi1>, vector<4x256xf32>
    %c16 = arith.constant 16 : index
    %c0_17 = arith.constant 0 : index
    %48 = vector.load %arg5[%c16, %c0_17] : memref<100x256xf32, #tpu.memory_space<vmem>>, vector<4x256xf32>
    tpu.vector_store %arg5[%c16, %c0_17], %47 {strides = array<i32>} : memref<100x256xf32, #tpu.memory_space<vmem>>, vector<4x256xf32>,
    %c18_i32 = arith.constant 18 : i32
    %49 = tpu.dynamic_rotate %1 by %c18_i32 dim 1 : vector<4x256xf32>, i32 -> vector<4x256xf32>
    %c2_i32_18 = arith.constant 2 : i32
    %50 = vector.broadcast %c2_i32_18 : i32 to vector<4x256xi32>
    %51 = arith.cmpi sge, %4, %50 : vector<4x256xi32>
    %c1_i32_19 = arith.constant 1 : i32
    %52 = vector.broadcast %c1_i32_19 : i32 to vector<4x256xi32>
    %53 = arith.cmpi sge, %6, %52 : vector<4x256xi32>
    %54 = arith.andi %51, %53 : vector<4x256xi1>
    %cst_20 = arith.constant 0.000000e+00 : f32
    %55 = vector.broadcast %cst_20 : f32 to vector<4x256xf32>
    %56 = arith.select %54, %49, %55 : vector<4x256xi1>, vector<4x256xf32>
    %c20 = arith.constant 20 : index
    %c0_21 = arith.constant 0 : index
    %57 = vector.load %arg5[%c20, %c0_21] : memref<100x256xf32, #tpu.memory_space<vmem>>, vector<4x256xf32>
    tpu.vector_store %arg5[%c20, %c0_21], %56 {strides = array<i32>} : memref<100x256xf32, #tpu.memory_space<vmem>>, vector<4x256xf32>,
    %c17_i32 = arith.constant 17 : i32
    %58 = tpu.dynamic_rotate %1 by %c17_i32 dim 1 : vector<4x256xf32>, i32 -> vector<4x256xf32>
    %c1_i32_22 = arith.constant 1 : i32
    %59 = vector.broadcast %c1_i32_22 : i32 to vector<4x256xi32>
    %60 = arith.cmpi sge, %4, %59 : vector<4x256xi32>
    %c1_i32_23 = arith.constant 1 : i32
    %61 = vector.broadcast %c1_i32_23 : i32 to vector<4x256xi32>
    %62 = arith.cmpi sge, %6, %61 : vector<4x256xi32>
    %63 = arith.andi %60, %62 : vector<4x256xi1>
    %cst_24 = arith.constant 0.000000e+00 : f32
    %64 = vector.broadcast %cst_24 : f32 to vector<4x256xf32>
    %65 = arith.select %63, %58, %64 : vector<4x256xi1>, vector<4x256xf32>
    %c24 = arith.constant 24 : index
    %c0_25 = arith.constant 0 : index
    %66 = vector.load %arg5[%c24, %c0_25] : memref<100x256xf32, #tpu.memory_space<vmem>>, vector<4x256xf32>
    tpu.vector_store %arg5[%c24, %c0_25], %65 {strides = array<i32>} : memref<100x256xf32, #tpu.memory_space<vmem>>, vector<4x256xf32>,
    %c16_i32 = arith.constant 16 : i32
    %67 = tpu.dynamic_rotate %1 by %c16_i32 dim 1 : vector<4x256xf32>, i32 -> vector<4x256xf32>
    %c1_i32_26 = arith.constant 1 : i32
    %68 = vector.broadcast %c1_i32_26 : i32 to vector<4x256xi32>
    %69 = arith.cmpi sge, %6, %68 : vector<4x256xi32>
    %cst_27 = arith.constant 0.000000e+00 : f32
    %70 = vector.broadcast %cst_27 : f32 to vector<4x256xf32>
    %71 = arith.select %69, %67, %70 : vector<4x256xi1>, vector<4x256xf32>
    %c28 = arith.constant 28 : index
    %c0_28 = arith.constant 0 : index
    %72 = vector.load %arg5[%c28, %c0_28] : memref<100x256xf32, #tpu.memory_space<vmem>>, vector<4x256xf32>
    tpu.vector_store %arg5[%c28, %c0_28], %71 {strides = array<i32>} : memref<100x256xf32, #tpu.memory_space<vmem>>, vector<4x256xf32>,
    %c15_i32_29 = arith.constant 15 : i32
    %73 = tpu.dynamic_rotate %1 by %c15_i32_29 dim 1 : vector<4x256xf32>, i32 -> vector<4x256xf32>
    %c15_i32_30 = arith.constant 15 : i32
    %74 = vector.broadcast %c15_i32_30 : i32 to vector<4x256xi32>
    %75 = arith.cmpi slt, %4, %74 : vector<4x256xi32>
    %c1_i32_31 = arith.constant 1 : i32
    %76 = vector.broadcast %c1_i32_31 : i32 to vector<4x256xi32>
    %77 = arith.cmpi sge, %6, %76 : vector<4x256xi32>
    %78 = arith.andi %75, %77 : vector<4x256xi1>
    %cst_32 = arith.constant 0.000000e+00 : f32
    %79 = vector.broadcast %cst_32 : f32 to vector<4x256xf32>
    %80 = arith.select %78, %73, %79 : vector<4x256xi1>, vector<4x256xf32>
    %c32 = arith.constant 32 : index
    %c0_33 = arith.constant 0 : index
    %81 = vector.load %arg5[%c32, %c0_33] : memref<100x256xf32, #tpu.memory_space<vmem>>, vector<4x256xf32>
    tpu.vector_store %arg5[%c32, %c0_33], %80 {strides = array<i32>} : memref<100x256xf32, #tpu.memory_space<vmem>>, vector<4x256xf32>,
    %c14_i32_34 = arith.constant 14 : i32
    %82 = tpu.dynamic_rotate %1 by %c14_i32_34 dim 1 : vector<4x256xf32>, i32 -> vector<4x256xf32>
    %c14_i32_35 = arith.constant 14 : i32
    %83 = vector.broadcast %c14_i32_35 : i32 to vector<4x256xi32>
    %84 = arith.cmpi slt, %4, %83 : vector<4x256xi32>
    %c1_i32_36 = arith.constant 1 : i32
    %85 = vector.broadcast %c1_i32_36 : i32 to vector<4x256xi32>
    %86 = arith.cmpi sge, %6, %85 : vector<4x256xi32>
    %87 = arith.andi %84, %86 : vector<4x256xi1>
    %cst_37 = arith.constant 0.000000e+00 : f32
    %88 = vector.broadcast %cst_37 : f32 to vector<4x256xf32>
    %89 = arith.select %87, %82, %88 : vector<4x256xi1>, vector<4x256xf32>
    %c36 = arith.constant 36 : index
    %c0_38 = arith.constant 0 : index
    %90 = vector.load %arg5[%c36, %c0_38] : memref<100x256xf32, #tpu.memory_space<vmem>>, vector<4x256xf32>
    tpu.vector_store %arg5[%c36, %c0_38], %89 {strides = array<i32>} : memref<100x256xf32, #tpu.memory_space<vmem>>, vector<4x256xf32>,
    %c2_i32_39 = arith.constant 2 : i32
    %91 = tpu.dynamic_rotate %1 by %c2_i32_39 dim 1 : vector<4x256xf32>, i32 -> vector<4x256xf32>
    %c2_i32_40 = arith.constant 2 : i32
    %92 = vector.broadcast %c2_i32_40 : i32 to vector<4x256xi32>
    %93 = arith.cmpi sge, %4, %92 : vector<4x256xi32>
    %cst_41 = arith.constant 0.000000e+00 : f32
    %94 = vector.broadcast %cst_41 : f32 to vector<4x256xf32>
    %95 = arith.select %93, %91, %94 : vector<4x256xi1>, vector<4x256xf32>
    %c40 = arith.constant 40 : index
    %c0_42 = arith.constant 0 : index
    %96 = vector.load %arg5[%c40, %c0_42] : memref<100x256xf32, #tpu.memory_space<vmem>>, vector<4x256xf32>
    tpu.vector_store %arg5[%c40, %c0_42], %95 {strides = array<i32>} : memref<100x256xf32, #tpu.memory_space<vmem>>, vector<4x256xf32>,
    %c1_i32_43 = arith.constant 1 : i32
    %97 = tpu.dynamic_rotate %1 by %c1_i32_43 dim 1 : vector<4x256xf32>, i32 -> vector<4x256xf32>
    %c1_i32_44 = arith.constant 1 : i32
    %98 = vector.broadcast %c1_i32_44 : i32 to vector<4x256xi32>
    %99 = arith.cmpi sge, %4, %98 : vector<4x256xi32>
    %cst_45 = arith.constant 0.000000e+00 : f32
    %100 = vector.broadcast %cst_45 : f32 to vector<4x256xf32>
    %101 = arith.select %99, %97, %100 : vector<4x256xi1>, vector<4x256xf32>
    %c44 = arith.constant 44 : index
    %c0_46 = arith.constant 0 : index
    %102 = vector.load %arg5[%c44, %c0_46] : memref<100x256xf32, #tpu.memory_space<vmem>>, vector<4x256xf32>
    tpu.vector_store %arg5[%c44, %c0_46], %101 {strides = array<i32>} : memref<100x256xf32, #tpu.memory_space<vmem>>, vector<4x256xf32>,
    %c48 = arith.constant 48 : index
    %c0_47 = arith.constant 0 : index
    %103 = vector.load %arg5[%c48, %c0_47] : memref<100x256xf32, #tpu.memory_space<vmem>>, vector<4x256xf32>
    tpu.vector_store %arg5[%c48, %c0_47], %1 {strides = array<i32>} : memref<100x256xf32, #tpu.memory_space<vmem>>, vector<4x256xf32>,
    %c255_i32 = arith.constant 255 : i32
    %104 = tpu.dynamic_rotate %1 by %c255_i32 dim 1 : vector<4x256xf32>, i32 -> vector<4x256xf32>
    %c15_i32_48 = arith.constant 15 : i32
    %105 = vector.broadcast %c15_i32_48 : i32 to vector<4x256xi32>
    %106 = arith.cmpi slt, %4, %105 : vector<4x256xi32>
    %cst_49 = arith.constant 0.000000e+00 : f32
    %107 = vector.broadcast %cst_49 : f32 to vector<4x256xf32>
    %108 = arith.select %106, %104, %107 : vector<4x256xi1>, vector<4x256xf32>
    %c52 = arith.constant 52 : index
    %c0_50 = arith.constant 0 : index
    %109 = vector.load %arg5[%c52, %c0_50] : memref<100x256xf32, #tpu.memory_space<vmem>>, vector<4x256xf32>
    tpu.vector_store %arg5[%c52, %c0_50], %108 {strides = array<i32>} : memref<100x256xf32, #tpu.memory_space<vmem>>, vector<4x256xf32>,
    %c254_i32 = arith.constant 254 : i32
    %110 = tpu.dynamic_rotate %1 by %c254_i32 dim 1 : vector<4x256xf32>, i32 -> vector<4x256xf32>
    %c14_i32_51 = arith.constant 14 : i32
    %111 = vector.broadcast %c14_i32_51 : i32 to vector<4x256xi32>
    %112 = arith.cmpi slt, %4, %111 : vector<4x256xi32>
    %cst_52 = arith.constant 0.000000e+00 : f32
    %113 = vector.broadcast %cst_52 : f32 to vector<4x256xf32>
    %114 = arith.select %112, %110, %113 : vector<4x256xi1>, vector<4x256xf32>
    %c56 = arith.constant 56 : index
    %c0_53 = arith.constant 0 : index
    %115 = vector.load %arg5[%c56, %c0_53] : memref<100x256xf32, #tpu.memory_space<vmem>>, vector<4x256xf32>
    tpu.vector_store %arg5[%c56, %c0_53], %114 {strides = array<i32>} : memref<100x256xf32, #tpu.memory_space<vmem>>, vector<4x256xf32>,
    %c242_i32 = arith.constant 242 : i32
    %116 = tpu.dynamic_rotate %1 by %c242_i32 dim 1 : vector<4x256xf32>, i32 -> vector<4x256xf32>
    %c2_i32_54 = arith.constant 2 : i32
    %117 = vector.broadcast %c2_i32_54 : i32 to vector<4x256xi32>
    %118 = arith.cmpi sge, %4, %117 : vector<4x256xi32>
    %c15_i32_55 = arith.constant 15 : i32
    %119 = vector.broadcast %c15_i32_55 : i32 to vector<4x256xi32>
    %120 = arith.cmpi slt, %6, %119 : vector<4x256xi32>
    %121 = arith.andi %118, %120 : vector<4x256xi1>
    %cst_56 = arith.constant 0.000000e+00 : f32
    %122 = vector.broadcast %cst_56 : f32 to vector<4x256xf32>
    %123 = arith.select %121, %116, %122 : vector<4x256xi1>, vector<4x256xf32>
    %c60 = arith.constant 60 : index
    %c0_57 = arith.constant 0 : index
    %124 = vector.load %arg5[%c60, %c0_57] : memref<100x256xf32, #tpu.memory_space<vmem>>, vector<4x256xf32>
    tpu.vector_store %arg5[%c60, %c0_57], %123 {strides = array<i32>} : memref<100x256xf32, #tpu.memory_space<vmem>>, vector<4x256xf32>,
    %c241_i32 = arith.constant 241 : i32
    %125 = tpu.dynamic_rotate %1 by %c241_i32 dim 1 : vector<4x256xf32>, i32 -> vector<4x256xf32>
    %c1_i32_58 = arith.constant 1 : i32
    %126 = vector.broadcast %c1_i32_58 : i32 to vector<4x256xi32>
    %127 = arith.cmpi sge, %4, %126 : vector<4x256xi32>
    %c15_i32_59 = arith.constant 15 : i32
    %128 = vector.broadcast %c15_i32_59 : i32 to vector<4x256xi32>
    %129 = arith.cmpi slt, %6, %128 : vector<4x256xi32>
    %130 = arith.andi %127, %129 : vector<4x256xi1>
    %cst_60 = arith.constant 0.000000e+00 : f32
    %131 = vector.broadcast %cst_60 : f32 to vector<4x256xf32>
    %132 = arith.select %130, %125, %131 : vector<4x256xi1>, vector<4x256xf32>
    %c64 = arith.constant 64 : index
    %c0_61 = arith.constant 0 : index
    %133 = vector.load %arg5[%c64, %c0_61] : memref<100x256xf32, #tpu.memory_space<vmem>>, vector<4x256xf32>
    tpu.vector_store %arg5[%c64, %c0_61], %132 {strides = array<i32>} : memref<100x256xf32, #tpu.memory_space<vmem>>, vector<4x256xf32>,
    %c240_i32 = arith.constant 240 : i32
    %134 = tpu.dynamic_rotate %1 by %c240_i32 dim 1 : vector<4x256xf32>, i32 -> vector<4x256xf32>
    %c15_i32_62 = arith.constant 15 : i32
    %135 = vector.broadcast %c15_i32_62 : i32 to vector<4x256xi32>
    %136 = arith.cmpi slt, %6, %135 : vector<4x256xi32>
    %cst_63 = arith.constant 0.000000e+00 : f32
    %137 = vector.broadcast %cst_63 : f32 to vector<4x256xf32>
    %138 = arith.select %136, %134, %137 : vector<4x256xi1>, vector<4x256xf32>
    %c68 = arith.constant 68 : index
    %c0_64 = arith.constant 0 : index
    %139 = vector.load %arg5[%c68, %c0_64] : memref<100x256xf32, #tpu.memory_space<vmem>>, vector<4x256xf32>
    tpu.vector_store %arg5[%c68, %c0_64], %138 {strides = array<i32>} : memref<100x256xf32, #tpu.memory_space<vmem>>, vector<4x256xf32>,
    %c239_i32 = arith.constant 239 : i32
    %140 = tpu.dynamic_rotate %1 by %c239_i32 dim 1 : vector<4x256xf32>, i32 -> vector<4x256xf32>
    %c15_i32_65 = arith.constant 15 : i32
    %141 = vector.broadcast %c15_i32_65 : i32 to vector<4x256xi32>
    %142 = arith.cmpi slt, %4, %141 : vector<4x256xi32>
    %c15_i32_66 = arith.constant 15 : i32
    %143 = vector.broadcast %c15_i32_66 : i32 to vector<4x256xi32>
    %144 = arith.cmpi slt, %6, %143 : vector<4x256xi32>
    %145 = arith.andi %142, %144 : vector<4x256xi1>
    %cst_67 = arith.constant 0.000000e+00 : f32
    %146 = vector.broadcast %cst_67 : f32 to vector<4x256xf32>
    %147 = arith.select %145, %140, %146 : vector<4x256xi1>, vector<4x256xf32>
    %c72 = arith.constant 72 : index
    %c0_68 = arith.constant 0 : index
    %148 = vector.load %arg5[%c72, %c0_68] : memref<100x256xf32, #tpu.memory_space<vmem>>, vector<4x256xf32>
    tpu.vector_store %arg5[%c72, %c0_68], %147 {strides = array<i32>} : memref<100x256xf32, #tpu.memory_space<vmem>>, vector<4x256xf32>,
    %c238_i32 = arith.constant 238 : i32
    %149 = tpu.dynamic_rotate %1 by %c238_i32 dim 1 : vector<4x256xf32>, i32 -> vector<4x256xf32>
    %c14_i32_69 = arith.constant 14 : i32
    %150 = vector.broadcast %c14_i32_69 : i32 to vector<4x256xi32>
    %151 = arith.cmpi slt, %4, %150 : vector<4x256xi32>
    %c15_i32_70 = arith.constant 15 : i32
    %152 = vector.broadcast %c15_i32_70 : i32 to vector<4x256xi32>
    %153 = arith.cmpi slt, %6, %152 : vector<4x256xi32>
    %154 = arith.andi %151, %153 : vector<4x256xi1>
    %cst_71 = arith.constant 0.000000e+00 : f32
    %155 = vector.broadcast %cst_71 : f32 to vector<4x256xf32>
    %156 = arith.select %154, %149, %155 : vector<4x256xi1>, vector<4x256xf32>
    %c76 = arith.constant 76 : index
    %c0_72 = arith.constant 0 : index
    %157 = vector.load %arg5[%c76, %c0_72] : memref<100x256xf32, #tpu.memory_space<vmem>>, vector<4x256xf32>
    tpu.vector_store %arg5[%c76, %c0_72], %156 {strides = array<i32>} : memref<100x256xf32, #tpu.memory_space<vmem>>, vector<4x256xf32>,
    %c226_i32 = arith.constant 226 : i32
    %158 = tpu.dynamic_rotate %1 by %c226_i32 dim 1 : vector<4x256xf32>, i32 -> vector<4x256xf32>
    %c2_i32_73 = arith.constant 2 : i32
    %159 = vector.broadcast %c2_i32_73 : i32 to vector<4x256xi32>
    %160 = arith.cmpi sge, %4, %159 : vector<4x256xi32>
    %c14_i32_74 = arith.constant 14 : i32
    %161 = vector.broadcast %c14_i32_74 : i32 to vector<4x256xi32>
    %162 = arith.cmpi slt, %6, %161 : vector<4x256xi32>
    %163 = arith.andi %160, %162 : vector<4x256xi1>
    %cst_75 = arith.constant 0.000000e+00 : f32
    %164 = vector.broadcast %cst_75 : f32 to vector<4x256xf32>
    %165 = arith.select %163, %158, %164 : vector<4x256xi1>, vector<4x256xf32>
    %c80 = arith.constant 80 : index
    %c0_76 = arith.constant 0 : index
    %166 = vector.load %arg5[%c80, %c0_76] : memref<100x256xf32, #tpu.memory_space<vmem>>, vector<4x256xf32>
    tpu.vector_store %arg5[%c80, %c0_76], %165 {strides = array<i32>} : memref<100x256xf32, #tpu.memory_space<vmem>>, vector<4x256xf32>,
    %c225_i32 = arith.constant 225 : i32
    %167 = tpu.dynamic_rotate %1 by %c225_i32 dim 1 : vector<4x256xf32>, i32 -> vector<4x256xf32>
    %c1_i32_77 = arith.constant 1 : i32
    %168 = vector.broadcast %c1_i32_77 : i32 to vector<4x256xi32>
    %169 = arith.cmpi sge, %4, %168 : vector<4x256xi32>
    %c14_i32_78 = arith.constant 14 : i32
    %170 = vector.broadcast %c14_i32_78 : i32 to vector<4x256xi32>
    %171 = arith.cmpi slt, %6, %170 : vector<4x256xi32>
    %172 = arith.andi %169, %171 : vector<4x256xi1>
    %cst_79 = arith.constant 0.000000e+00 : f32
    %173 = vector.broadcast %cst_79 : f32 to vector<4x256xf32>
    %174 = arith.select %172, %167, %173 : vector<4x256xi1>, vector<4x256xf32>
    %c84 = arith.constant 84 : index
    %c0_80 = arith.constant 0 : index
    %175 = vector.load %arg5[%c84, %c0_80] : memref<100x256xf32, #tpu.memory_space<vmem>>, vector<4x256xf32>
    tpu.vector_store %arg5[%c84, %c0_80], %174 {strides = array<i32>} : memref<100x256xf32, #tpu.memory_space<vmem>>, vector<4x256xf32>,
    %c224_i32 = arith.constant 224 : i32
    %176 = tpu.dynamic_rotate %1 by %c224_i32 dim 1 : vector<4x256xf32>, i32 -> vector<4x256xf32>
    %c14_i32_81 = arith.constant 14 : i32
    %177 = vector.broadcast %c14_i32_81 : i32 to vector<4x256xi32>
    %178 = arith.cmpi slt, %6, %177 : vector<4x256xi32>
    %cst_82 = arith.constant 0.000000e+00 : f32
    %179 = vector.broadcast %cst_82 : f32 to vector<4x256xf32>
    %180 = arith.select %178, %176, %179 : vector<4x256xi1>, vector<4x256xf32>
    %c88 = arith.constant 88 : index
    %c0_83 = arith.constant 0 : index
    %181 = vector.load %arg5[%c88, %c0_83] : memref<100x256xf32, #tpu.memory_space<vmem>>, vector<4x256xf32>
    tpu.vector_store %arg5[%c88, %c0_83], %180 {strides = array<i32>} : memref<100x256xf32, #tpu.memory_space<vmem>>, vector<4x256xf32>,
    %c223_i32 = arith.constant 223 : i32
    %182 = tpu.dynamic_rotate %1 by %c223_i32 dim 1 : vector<4x256xf32>, i32 -> vector<4x256xf32>
    %c15_i32_84 = arith.constant 15 : i32
    %183 = vector.broadcast %c15_i32_84 : i32 to vector<4x256xi32>
    %184 = arith.cmpi slt, %4, %183 : vector<4x256xi32>
    %c14_i32_85 = arith.constant 14 : i32
    %185 = vector.broadcast %c14_i32_85 : i32 to vector<4x256xi32>
    %186 = arith.cmpi slt, %6, %185 : vector<4x256xi32>
    %187 = arith.andi %184, %186 : vector<4x256xi1>
    %cst_86 = arith.constant 0.000000e+00 : f32
    %188 = vector.broadcast %cst_86 : f32 to vector<4x256xf32>
    %189 = arith.select %187, %182, %188 : vector<4x256xi1>, vector<4x256xf32>
    %c92 = arith.constant 92 : index
    %c0_87 = arith.constant 0 : index
    %190 = vector.load %arg5[%c92, %c0_87] : memref<100x256xf32, #tpu.memory_space<vmem>>, vector<4x256xf32>
    tpu.vector_store %arg5[%c92, %c0_87], %189 {strides = array<i32>} : memref<100x256xf32, #tpu.memory_space<vmem>>, vector<4x256xf32>,
    %c222_i32 = arith.constant 222 : i32
    %191 = tpu.dynamic_rotate %1 by %c222_i32 dim 1 : vector<4x256xf32>, i32 -> vector<4x256xf32>
    %c14_i32_88 = arith.constant 14 : i32
    %192 = vector.broadcast %c14_i32_88 : i32 to vector<4x256xi32>
    %193 = arith.cmpi slt, %4, %192 : vector<4x256xi32>
    %c14_i32_89 = arith.constant 14 : i32
    %194 = vector.broadcast %c14_i32_89 : i32 to vector<4x256xi32>
    %195 = arith.cmpi slt, %6, %194 : vector<4x256xi32>
    %196 = arith.andi %193, %195 : vector<4x256xi1>
    %cst_90 = arith.constant 0.000000e+00 : f32
    %197 = vector.broadcast %cst_90 : f32 to vector<4x256xf32>
    %198 = arith.select %196, %191, %197 : vector<4x256xi1>, vector<4x256xf32>
    %c96 = arith.constant 96 : index
    %c0_91 = arith.constant 0 : index
    %199 = vector.load %arg5[%c96, %c0_91] : memref<100x256xf32, #tpu.memory_space<vmem>>, vector<4x256xf32>
    tpu.vector_store %arg5[%c96, %c0_91], %198 {strides = array<i32>} : memref<100x256xf32, #tpu.memory_space<vmem>>, vector<4x256xf32>,
    %c0_92 = arith.constant 0 : index
    %c0_93 = arith.constant 0 : index
    %200 = vector.load %arg2[%c0_92, %c0_93] : memref<8x100xf32, #tpu.memory_space<vmem>>, vector<8x100xf32>
    %c0_94 = arith.constant 0 : index
    %c0_95 = arith.constant 0 : index
    %201 = vector.load %arg5[%c0_94, %c0_95] : memref<100x256xf32, #tpu.memory_space<vmem>>, vector<100x256xf32>
    %cst_96 = arith.constant dense<0.000000e+00> : vector<8x256xf32>
    %202 = tpu.matmul %200, %201, %cst_96 {dimension_numbers = #tpu.dot_dimension_numbers<[1], [0], [0], [1], [0, 0, 1, 1], [], []>} : vector<8x100xf32>, vector<100x256xf32>, vector<8x256xf32> -> vector<8x256xf32>
    %c0_97 = arith.constant 0 : index
    %c0_98 = arith.constant 0 : index
    %203 = vector.load %arg3[%c0_97, %c0_98] : memref<8x1xf32, #tpu.memory_space<vmem>>, vector<8x1xf32>
    %204 = vector.broadcast %203 : vector<8x1xf32> to vector<8x256xf32>
    %205 = arith.addf %202, %204 : vector<8x256xf32>
    %c0_99 = arith.constant 0 : index
    %c0_100 = arith.constant 0 : index
    %c0_101 = arith.constant 0 : index
    %206 = vector.load %arg4[%c0_99, %c0_100, %c0_101] : memref<1x8x256xf32, #tpu.memory_space<vmem>>, vector<1x8x256xf32>
    %207 = vector.shape_cast %206 : vector<1x8x256xf32> to vector<8x256xf32>
    %208 = vector.shape_cast %205 : vector<8x256xf32> to vector<1x8x256xf32>
    tpu.vector_store %arg4[%c0_99, %c0_100, %c0_101], %208 {strides = array<i32>} : memref<1x8x256xf32, #tpu.memory_space<vmem>>, vector<1x8x256xf32>,
    return
  }
  func.func @transform_0(%arg0: i32) -> (i32, i32, i32) {
    %c0_i32 = arith.constant 0 : i32
    %c0_i32_0 = arith.constant 0 : i32
    %c0_i32_1 = arith.constant 0 : i32
    return %arg0, %c0_i32, %c0_i32_0 : i32, i32, i32
  }
  func.func @transform_1(%arg0: i32) -> (i32, i32) {
    %c0_i32 = arith.constant 0 : i32
    %c0_i32_0 = arith.constant 0 : i32
    %c0_i32_1 = arith.constant 0 : i32
    return %c0_i32, %c0_i32_0 : i32, i32
  }
  func.func @transform_2(%arg0: i32) -> (i32, i32) {
    %c0_i32 = arith.constant 0 : i32
    %c0_i32_0 = arith.constant 0 : i32
    %c0_i32_1 = arith.constant 0 : i32
    return %c0_i32, %c0_i32_0 : i32, i32
  }
  func.func @transform_3(%arg0: i32) -> (i32, i32, i32) {
    %c0_i32 = arith.constant 0 : i32
    %c0_i32_0 = arith.constant 0 : i32
    %c0_i32_1 = arith.constant 0 : i32
    return %arg0, %c0_i32, %c0_i32_0 : i32, i32, i32
  }
}

</mosaic_0001>

<bundles_post_ra>
// kernel: tpu_custom_call.1
= control target key start
LH: loop header
LB: loop body
LE: loop exit
PB: predicated region body
PF: predicated region fallthrough
CT: control target
= control target key end

     0   :  { %8 = vsyncpa [#allocation4], 0  ;;  %s1586_s0 = inlined_call_operand.hbm [shape: f32[2,4,256], index: 0, kind: input, shape index: {}]   ;;  %s1587_s1 = inlined_call_operand.vmem [shape: f32[8,100], index: 1, kind: input, shape index: {}]   ;;  %s1588_s2 = inlined_call_operand.vmem [shape: f32[8,1], index: 2, kind: input, shape index: {}]   ;;  %s1589_s3 = inlined_call_operand.hbm [shape: f32[2,8,256], index: 3, kind: output, shape index: {}]  }
   0x1   :  { %10 = vsyncpa [#allocation4 + $0x1], 0 }
   0x2   :  { %11 = vsyncpa [#allocation5], 0 }
   0x3   :  { %13 = vsyncpa [#allocation5 + $0x1], 0  ;;  %s1049_s12 = smov 0   ;;  %s1051_s13 = smov 0  }
   0x4   :  { %s1053_s14 = smov 0   ;;  %s1055_s15 = smov 0  }
   0x5 LB: > { %s1070_s16 = sadd.s32 4294967295, %s999_s15   ;;  %s786_s17 = sadd.s32 4294967294, %s999_s15   ;;  %s999_s15 = sphi %s1055_s15, %s1636_s15   ;;  %s995_s14 = sphi %s1053_s14, %s1635_s14   ;;  %s991_s13 = sphi %s1051_s13, %s1634_s13   ;;  %s987_s12 = sphi %s1049_s12, %s1633_s12  }
   0x6   : > { %s1074_s18 = sadd.s32 1, %s999_s15   ;;  %s26_s19 = sadd.s32 1, %s995_s14 }
   0x7   : > { %s23_s20 = ssub.s32 %s999_s15, %s1074_s18  ;;  %p33_p0 = scmp.ne.s32.totalorder %s995_s14, %s991_s13 }
   0x8   : > { %p24_p1 = scmp.eq.s32.totalorder %s23_s20, 0  ;;  %p34_p2 = scmp.eq.s32.totalorder %s999_s15, 0 }
   0x9   : > { %p39_p3 = scmp.ne.s32.totalorder %s991_s13, %s987_s12  ;;  %p40_p4 = scmp.eq.s32.totalorder %s1070_s16, 0 }
   0xa   : > { %s1086_s21 = scalar_select %p24_p1, %s995_s14, %s26_s19  }
   0xb   : > { %p1088_p5 = por %p34_p2, %p33_p0  ;;  %p1092_p6 = por %p40_p4, %p39_p3 }
   0xc   : > { %p105_p7 = scmp.eq.s32.totalorder %s1070_s16, 1  ;;  %p111_p8 = scmp.eq.s32.totalorder %s786_s17, 1 }
   0xd   : > { %p841_p10 = scmp.lt.s32.totalorder %s999_s15, 2  ;;  %s137_s26 = sand.u32 1, %s995_s14  }
   0xe   : > { %p1099_p11 = por %p105_p7, %p33_p0  ;;  %p1103_p12 = por %p111_p8, %p39_p3 }
   0xf   : > { %s803_s27 = sshll.u32 %s999_s15, 7  ;;  %s789_s28 = sshll.u32 %s137_s26, 3 }
  0x10   : > { %s1593_s24 = scalar_select %p1099_p11, 1, 0 }
  0x11   : > { %s1594_s25 = scalar_select %p1103_p12, 1, 0 }
  0x12   : > { %s1112_s4 = scalar_lea.hbm %s1586_s0, %s803_s27  ;;  %s141_s5 = scalar_lea.vmem [#allocation3], %s789_s28 }
  0x13   : > { %s149_s6 = sshll.u32 %s141_s5, 4  ;;  %p1116_p13 = pnand %p841_p10, %p1088_p5  ;;  %s1120_s6 = int_to_ptr.vmem [resolvable:$true] %s149_s6 }
  0x14   : > { %s138_s8 = scalar_lea.sflag [#allocation4], %s137_s26  ;;  %s903_s9 = scalar_lea.hbm %s1112_s4, 128 }
  0x15   : > { %p904_p2 = scmp.ne.s32.totalorder %s1112_s4, %s903_s9  ;;  %p905_p3 = pneg %p1116_p13 }
  0x16   : > { %s908_s17 = scalar_lea.hbm %s1586_s0, 256  ;;  %p909_p5 = scmp.lt.u32.totalorder %s1112_s4, %s1586_s0 }
  0x17   : > { %p906_p4 = pnand %p905_p3, %p904_p2  ;;  %p910_p8 = scmp.lt.u32.totalorder %s908_s17, %s903_s9 }
  0x18   : > { %p912_p9 = scmp.lt.u32.totalorder %s903_s9, %s1112_s4 }
  0x19   : > { %p907_p7 = pneg %p906_p4  ;;  %p911_p10 = por %p910_p8, %p909_p5 }
  0x1b   : > { %p913_p0 = por %p912_p9, %p911_p10 }
  0x1d   : > { %p914_p1 = pnand %p913_p0, %p907_p7 }
  0x1f   : > { %917 = shalt.err (!%p914_p1)
}
  0x20   : > { %s918_s22 = scalar_lea.vmem %s1120_s6, 128  ;;  %s1001_s26 = smov [#allocation3]  }
  0x21   : > { %p919_p2 = scmp.ne.s32.totalorder %s1120_s6, %s918_s22  ;;  %s923_s27 = sshll.u32 %s1001_s26, 4  ;;  %s924_s27 = int_to_ptr.vmem [resolvable:$false] %s923_s27 }
  0x22   : > { %s925_s28 = scalar_lea.vmem %s924_s27, 256  ;;  %p926_p11 = scmp.lt.s32.totalorder %s1120_s6, %s924_s27 }
  0x23   : > { %p921_p4 = pnand %p919_p2, %p905_p3  ;;  %p927_p5 = scmp.lt.s32.totalorder %s925_s28, %s918_s22 }
  0x25   : > { %p922_p12 = pneg %p921_p4  ;;  %p928_p8 = por %p927_p5, %p926_p11 }
  0x27   : > { %p929_p9 = pnand %p928_p8, %p922_p12 }
  0x29   : > { %932 = shalt.err (!%p929_p9)
}
  0x2a   : > { %836 = dma.hbm_to_vmem [thread:$0]  (!%p1116_p13), %s1112_s4, 128, %s1120_s6, %s138_s8  }
  0x2b   : > { %p1596_p0 = scmp.lt.s32.totalorder %s999_s15, 3  ;;  %p1597_p1 = scmp.ge.s32.totalorder %s999_s15, 1 }
  0x2d   : > { %p155_p3 = pnand %p1597_p1, %p1596_p0 }
  0x2e   : > { %s1154_s29 = sand.u32 (!%p155_p3), 1, %s991_s13  }
  0x2f   : > { %158 = sbr.rel (%p155_p3) target bundleno = 506 (0x1fa), region = 32  ;;  %s793_s30 = sshll.u32 (!%p155_p3), %s1154_s29, 3 }
  0x30   : > { %s161_s5 = scalar_lea.sflag (!%p155_p3), [#allocation4], %s1154_s29  ;;  %s164_s9 = scalar_lea.vmem (!%p155_p3), [#allocation3], %s793_s30 }
  0x36   : > { %978 = dma.done.wait (%p1092_p6), %s161_s5, 128  }
  0x37   : > { %980 = vsyncadd (%p1092_p6), %s161_s5, 4294967168  ;;  %v1162_v0 = vld [vmem:[%s164_s9] sm:$0xff]  ;;  %s1002_s4 = smov 31   ;;  %s1003_s6 = smov 33   ;;  %v1026_v2 = vmov 0.0   ;;  %v611_v3 = vld [vmem:[%s1588_s2] sm:$0xff]  ;;  %v188_v5 = vlaneseq }
  0x38   : > { %247 = vrot.lane.b32.xlu1 %v1162_v0, %s1002_s4  ;;  %394 = vst [vmem:[#allocation2 + $0x60] sm:$0xf] %v1162_v0  ;;  %215 = vrot.lane.b32.xlu0 %v1162_v0, %s1003_s6  ;;  %v1169_v1 = vcombine.high %v1162_v0, %v1162_v0  ;;  %s1004_s7 = smov 34   ;;  %s1005_s23 = smov 32   ;;  %v1027_v4 = vmov 0  }
  0x39   : > { %s1006_s8 = smov 18   ;;  %s1007_s10 = smov 16   ;;  %692 = vmatprep.mubr.f32.mxu0 %v1026_v2  ;;  %901 = vset.pattern.permute.xlu0 %v1027_v4  ;;  %v1221_v6 = vand.u32 127, %v188_v5 }
  0x3a   : > { %395 = vst [vmem:[#allocation2 + $0x68] sm:$0xf] %v1169_v1  ;;  %s1008_s11 = smov 30   ;;  %s1009_s17 = smov 17  }
  0x3b   : > { %s1010_s19 = smov 14   ;;  %s1011_s20 = smov 1   ;;  %v190_v7 = vadd.s32 128, %v1221_v6  ;;  %v1225_v8 = vand.u32 15, %v1221_v6  ;;  %v1228_v9 = vshra.s32 %v1221_v6, 4  ;;  %vm251_vm5 = vcmp.lt.s32.totalorder %v1221_v6, 31 }
  0x3c   : > { %198 = vrot.lane.b32.xlu0 %v1162_v0, %s1004_s7  ;;  %249 = vrot.lane.b32.xlu1 %v1169_v1, %s1002_s4  ;;  %s1012_s22 = smov 15   ;;  %s1013_s26 = smov 2   ;;  %vm202_vm13 = vcmp.lt.s32.totalorder %v1221_v6, 34  ;;  %vm219_vm14 = vcmp.lt.s32.totalorder %v1221_v6, 33 }
  0x3d   : > { %s1014_s27 = smov 127   ;;  %s1015_s28 = smov 114   ;;  %v1230_v10 = vand.u32 15, %v190_v7  ;;  %v1232_v11 = vshra.s32 %v190_v7, 4  ;;  %vm207_vm0 = vcmp.ge.s32.totalorder %v1228_v9, 2  ;;  %vm254_vm1 = vcmp.lt.s32.totalorder %v1225_v8, 15 }
  0x3e   : > { %s1016_s30 = smov 126   ;;  %s1017_s5 = smov 112   ;;  %vm205_vm4 = vcmp.ge.s32.totalorder %v1225_v8, 2  ;;  %vm1244_vm6 = vmand %vm254_vm1, %vm207_vm0  ;;  %vm222_vm9 = vcmp.ge.s32.totalorder %v1225_v8, 1 }
  0x3f   : > { %s1018_s9 = smov 110   ;;  %s1019_s4 = smov 113   ;;  %vm208_vm2 = vcmp.ge.s32.totalorder %v1232_v11, 2  ;;  %vm255_vm3 = vcmp.lt.s32.totalorder %v1230_v10, 15  ;;  %vm206_vm7 = vcmp.ge.s32.totalorder %v1230_v10, 2  ;;  %vm1258_vm10 = vmand %vm205_vm4, %vm207_vm0  ;;  %vm223_vm11 = vcmp.ge.s32.totalorder %v1230_v10, 1 }
  0x40   : > { %200 = vrot.lane.b32.xlu1 %v1169_v1, %s1004_s7  ;;  %217 = vrot.lane.b32.xlu0 %v1169_v1, %s1003_s6  ;;  %s1020_s6 = smov 111   ;;  %s1021_s7 = smov 97   ;;  %vm257_vm8 = vmand %vm255_vm3, %vm208_vm2 }
  0x41   : > { %vm1267_vm12 = vmand %vm206_vm7, %vm208_vm2  ;;  %p1630_p11 = scmp.ne.s32.totalorder %s1593_s24, 0 }
  0x42   : > { %vm1279_vm15 = vmand %vm222_vm9, %vm207_vm0 }
  0x44   : > { %238 = vrot.lane.b32.xlu1 %v1169_v1, %s1005_s23  ;;  %236 = vrot.lane.b32.xlu0 %v1162_v0, %s1005_s23  ;;  %s1022_s23 = smov 95  }
  0x48   : > { %285 = vrot.lane.b32.xlu1 %v1169_v1, %s1006_s8  ;;  %283 = vrot.lane.b32.xlu0 %v1162_v0, %s1006_s8  ;;  %s1023_s8 = smov 98  }
  0x4c   : > { %319 = vrot.lane.b32.xlu1 %v1169_v1, %s1007_s10  ;;  %317 = vrot.lane.b32.xlu0 %v1162_v0, %s1007_s10  ;;  %s1024_s10 = smov 96  }
  0x50   : > { %270 = vrot.lane.b32.xlu1 %v1169_v1, %s1008_s11  ;;  %268 = vrot.lane.b32.xlu0 %v1162_v0, %s1008_s11  ;;  %s1025_s11 = smov 94  }
  0x54   : > { %306 = vrot.lane.b32.xlu1 %v1169_v1, %s1009_s17  ;;  %304 = vrot.lane.b32.xlu0 %v1162_v0, %s1009_s17 }
  0x58   : > { %349 = vrot.lane.b32.xlu1 %v1169_v1, %s1010_s19  ;;  %347 = vrot.lane.b32.xlu0 %v1162_v0, %s1010_s19 }
  0x5c   : > { %379 = vrot.lane.b32.xlu1 %v1169_v1, %s1011_s20  ;;  %377 = vrot.lane.b32.xlu0 %v1162_v0, %s1011_s20 }
  0x60   : > { %336 = vrot.lane.b32.xlu1 %v1169_v1, %s1012_s22  ;;  %334 = vrot.lane.b32.xlu0 %v1162_v0, %s1012_s22 }
  0x64   : > { %368 = vrot.lane.b32.xlu1 %v1169_v1, %s1013_s26  ;;  %366 = vrot.lane.b32.xlu0 %v1162_v0, %s1013_s26  ;;  %s794_s26 = sshll.u32 %s1154_s29, 4 }
  0x68   : > { %398 = vrot.lane.b32.xlu1 %v1169_v1, %s1014_s27  ;;  %396 = vrot.lane.b32.xlu0 %v1162_v0, %s1014_s27  ;;  %s804_s27 = sshll.u32 %s1070_s16, 8 }
  0x6c   : > { %426 = vrot.lane.b32.xlu1 %v1169_v1, %s1015_s28  ;;  %424 = vrot.lane.b32.xlu0 %v1162_v0, %s1015_s28  ;;  %s186_s28 = scalar_lea.vmem [#allocation6], %s794_s26 }
  0x70   : > { %415 = vrot.lane.b32.xlu1 %v1169_v1, %s1016_s30  ;;  %413 = vrot.lane.b32.xlu0 %v1162_v0, %s1016_s30  ;;  %s716_s30 = sshll.u32 %s186_s28, 4  ;;  %s1544_s30 = int_to_ptr.vmem [resolvable:$true] %s716_s30 }
  0x71   : > { %s933_s16 = scalar_lea.vmem %s1544_s30, 256 }
  0x72   : > { %p934_p6 = scmp.ne.s32.totalorder %s1544_s30, %s933_s16 }
  0x74   : > { %460 = vrot.lane.b32.xlu1 %v1169_v1, %s1017_s5  ;;  %458 = vrot.lane.b32.xlu0 %v1162_v0, %s1017_s5  ;;  %p935_p12 = pnand %p934_p6, %p1630_p11 }
  0x76   : > { %p936_p13 = pneg %p935_p12 }
  0x78   : > { %490 = vrot.lane.b32.xlu1 %v1169_v1, %s1018_s9  ;;  %488 = vrot.lane.b32.xlu0 %v1162_v0, %s1018_s9 }
  0x7c   : > { %447 = vrot.lane.b32.xlu1 %v1169_v1, %s1019_s4  ;;  %445 = vrot.lane.b32.xlu0 %v1162_v0, %s1019_s4  ;;  %s1542_s4 = scalar_lea.hbm %s1589_s3, %s804_s27 }
  0x80   : > { %477 = vrot.lane.b32.xlu1 %v1169_v1, %s1020_s6  ;;  %475 = vrot.lane.b32.xlu0 %v1162_v0, %s1020_s6  ;;  %s702_s6 = scalar_lea.sflag [#allocation5], %s1154_s29 }
  0x84   : > { %524 = vrot.lane.b32.xlu1 %v1169_v1, %s1021_s7  ;;  %522 = vrot.lane.b32.xlu0 %v1162_v0, %s1021_s7  ;;  %s1028_s7 = smov [#allocation6]  }
  0x88   : > { %554 = vrot.lane.b32.xlu1 %v1169_v1, %s1022_s23  ;;  %552 = vrot.lane.b32.xlu0 %v1162_v0, %s1022_s23  ;;  %s937_s23 = sshll.u32 %s1028_s7, 4  ;;  %s938_s23 = int_to_ptr.vmem [resolvable:$false] %s937_s23 }
  0x89   : > { %p940_p7 = scmp.lt.s32.totalorder %s1544_s30, %s938_s23 }
  0x8c   : > { %509 = vrot.lane.b32.xlu1 %v1169_v1, %s1023_s8  ;;  %507 = vrot.lane.b32.xlu0 %v1162_v0, %s1023_s8  ;;  %s939_s8 = scalar_lea.vmem %s938_s23, 512 }
  0x8d   : > { %p941_p10 = scmp.lt.s32.totalorder %s939_s8, %s933_s16 }
  0x8f   : > { %p942_p2 = por %p941_p10, %p940_p7 }
  0x90   : > { %543 = vrot.lane.b32.xlu1 %v1169_v1, %s1024_s10  ;;  %541 = vrot.lane.b32.xlu0 %v1162_v0, %s1024_s10 }
  0x91   : > { %p943_p4 = pnand %p942_p2, %p936_p13 }
  0x94   : > { %573 = vrot.lane.b32.xlu1 %v1169_v1, %s1025_s11  ;;  %571 = vrot.lane.b32.xlu0 %v1162_v0, %s1025_s11 }
  0x98   : > { %614 = vperm.xlu0 %901, %v611_v3  }
  0xaa   : > { %v248_v12 = vpop.permute.xlu1 %247  ;;  %v216_v13 = vpop.permute.xlu0 %215 }
  0xae   : > { %v199_v15 = vpop.permute.xlu0 %198  ;;  %v250_v16 = vpop.permute.xlu1 %249 }
  0xaf   : > { %v252_v18 = vsel %vm251_vm5, %v248_v12, %v250_v16  ;;  %v253_v19 = vsel %vm251_vm5, %v250_v16, %v248_v12  ;;  %vm1287_vm5 = vmand %vm223_vm11, %vm208_vm2 }
  0xb0   : > { %v258_v21 = vsel %vm1244_vm6, %v253_v19, 0.0  ;;  %v259_v22 = vsel %vm257_vm8, %v252_v18, 0.0  ;;  %vm240_vm6 = vcmp.lt.s32.totalorder %v1221_v6, 32  ;;  %vm290_vm8 = vcmp.ge.s32.totalorder %v1228_v9, 1 }
  0xb1   : > { %v262_v24 = vrot.slane %v258_v21, 4  ;;  %v263_v25 = vrot.slane %v259_v22, 4 }
  0xb2   : > { %v201_v27 = vpop.permute.xlu1 %200  ;;  %v218_v28 = vpop.permute.xlu0 %217 }
  0xb3   : > { %266 = vst [vmem:[#allocation2 + $0x10] sm:$0xf0] %v262_v24  ;;  %267 = vst [vmem:[#allocation2 + $0x18] sm:$0xf0] %v263_v25  ;;  %v203_v29 = vsel %vm202_vm13, %v199_v15, %v201_v27  ;;  %v204_v30 = vsel %vm202_vm13, %v201_v27, %v199_v15  ;;  %v220_v31 = vsel %vm219_vm14, %v216_v13, %v218_v28  ;;  %vm291_vm13 = vcmp.ge.s32.totalorder %v1232_v11, 1 }
  0xb4   : > { %v221_v32 = vsel %vm219_vm14, %v218_v28, %v216_v13  ;;  %v211_v33 = vsel %vm1258_vm10, %v204_v30, 0.0  ;;  %v212_v34 = vsel %vm1267_vm12, %v203_v29, 0.0  ;;  %v227_v36 = vsel %vm1287_vm5, %v220_v31, 0.0  ;;  %vm292_vm12 = vmand %vm205_vm4, %vm290_vm8 }
  0xb5   : > { %v226_v35 = vsel %vm1279_vm15, %v221_v32, 0.0  ;;  %213 = vst [vmem:[#allocation2] sm:$0xf] %v211_v33  ;;  %214 = vst [vmem:[#allocation2 + $0x8] sm:$0xf] %v212_v34  ;;  %v231_v38 = vrot.slane %v227_v36, 4 }
  0xb6   : > { %v230_v37 = vrot.slane %v226_v35, 4  ;;  %v239_v39 = vpop.permute.xlu1 %238  ;;  %v237_v40 = vpop.permute.xlu0 %236  ;;  %vm287_vm10 = vcmp.lt.s32.totalorder %v1221_v6, 18  ;;  %vm293_vm14 = vmand %vm206_vm7, %vm291_vm13  ;;  %vm321_vm15 = vcmp.lt.s32.totalorder %v1221_v6, 16  ;;  %vm275_vm5 = vcmp.lt.s32.totalorder %v1225_v8, 14 }
  0xb7   : > { %235 = vst [vmem:[#allocation2 + $0x8] sm:$0xf0] %v231_v38  ;;  %v241_v41 = vsel %vm240_vm6, %v237_v40, %v239_v39  ;;  %v242_v42 = vsel %vm240_vm6, %v239_v39, %v237_v40  ;;  %vm276_vm6 = vcmp.lt.s32.totalorder %v1230_v10, 14 }
  0xb8   : > { %234 = vst [vmem:[#allocation2] sm:$0xf0] %v230_v37  ;;  %v243_v43 = vsel %vm207_vm0, %v242_v42, 0.0  ;;  %v244_v44 = vsel %vm208_vm2, %v241_v41, 0.0 }
  0xb9   : > { %245 = vst [vmem:[#allocation2 + $0x10] sm:$0xf] %v243_v43  ;;  %246 = vst [vmem:[#allocation2 + $0x18] sm:$0xf] %v244_v44 }
  0xba   : > { %v286_v45 = vpop.permute.xlu1 %285  ;;  %v284_v46 = vpop.permute.xlu0 %283 }
  0xbb   : > { %v288_v47 = vsel %vm287_vm10, %v284_v46, %v286_v45  ;;  %v289_v48 = vsel %vm287_vm10, %v286_v45, %v284_v46  ;;  %vm1326_vm10 = vmand %vm275_vm5, %vm207_vm0 }
  0xbc   : > { %v294_v49 = vsel %vm292_vm12, %v289_v48, 0.0  ;;  %v295_v50 = vsel %vm293_vm14, %v288_v47, 0.0  ;;  %vm272_vm12 = vcmp.lt.s32.totalorder %v1221_v6, 30  ;;  %vm1339_vm0 = vmand %vm276_vm6, %vm208_vm2  ;;  %vm308_vm2 = vcmp.lt.s32.totalorder %v1221_v6, 17 }
  0xbd   : > { %v298_v51 = vrot.slane %v294_v49, 4  ;;  %v299_v52 = vrot.slane %v295_v50, 4  ;;  %vm311_vm14 = vmand %vm222_vm9, %vm290_vm8 }
  0xbe   : > { %v320_v53 = vpop.permute.xlu1 %319  ;;  %v318_v54 = vpop.permute.xlu0 %317  ;;  %v586_v58 = vld [vmem:[#allocation2 + $0x8] sm:$0xff] }
  0xbf   : > { %302 = vst [vmem:[#allocation2 + $0x20] sm:$0xf0] %v298_v51  ;;  %303 = vst [vmem:[#allocation2 + $0x28] sm:$0xf0] %v299_v52  ;;  %v322_v55 = vsel %vm321_vm15, %v318_v54, %v320_v53  ;;  %v323_v56 = vsel %vm321_vm15, %v320_v53, %v318_v54  ;;  %v585_v62 = vld [vmem:[#allocation2] sm:$0xff] }
  0xc0   : > { %v324_v59 = vsel %vm290_vm8, %v323_v56, 0.0  ;;  %v325_v60 = vsel %vm291_vm13, %v322_v55, 0.0  ;;  %v588_v61 = vld [vmem:[#allocation2 + $0x18] sm:$0xff]  ;;  %v587_v63 = vld [vmem:[#allocation2 + $0x10] sm:$0xff]  ;;  %vm312_vm15 = vmand %vm223_vm11, %vm291_vm13 }
  0xc1   : > { %v328_v0 = vrot.slane %v324_v59, 4  ;;  %v329_v1 = vrot.slane %v325_v60, 4  ;;  %v805_v3 = vpack.c.bf16 %v588_v61, %v586_v58  ;;  %v807_v4 = vpack.c.bf16 %v587_v63, %v585_v62 }
  0xc2   : > { %v271_v5 = vpop.permute.xlu1 %270  ;;  %v269_v7 = vpop.permute.xlu0 %268 }
  0xc3   : > { %332 = vst [vmem:[#allocation2 + $0x30] sm:$0xf0] %v328_v0  ;;  %333 = vst [vmem:[#allocation2 + $0x38] sm:$0xf0] %v329_v1  ;;  %v273_v12 = vsel %vm272_vm12, %v269_v7, %v271_v5  ;;  %v274_v13 = vsel %vm272_vm12, %v271_v5, %v269_v7  ;;  %806 = vmatprep.subr.bf16.mxu0 %v805_v3 }
  0xc4   : > { %v279_v14 = vsel %vm1326_vm10, %v274_v13, 0.0  ;;  %v280_v15 = vsel %vm1339_vm0, %v273_v12, 0.0  ;;  %808 = vmatpush1.bf16.msra.mxu0 %v807_v4  ;;  %vm351_vm10 = vcmp.lt.s32.totalorder %v1221_v6, 14  ;;  %vm354_vm12 = vmand %vm275_vm5, %vm290_vm8 }
  0xc5   : > { %281 = vst [vmem:[#allocation2 + $0x20] sm:$0xf] %v279_v14  ;;  %282 = vst [vmem:[#allocation2 + $0x28] sm:$0xf] %v280_v15 }
  0xc6   : > { %v307_v16 = vpop.permute.xlu1 %306  ;;  %v305_v17 = vpop.permute.xlu0 %304  ;;  %vm355_vm0 = vmand %vm276_vm6, %vm291_vm13 }
  0xc7   : > { %v309_v18 = vsel %vm308_vm2, %v305_v17, %v307_v16  ;;  %v310_v19 = vsel %vm308_vm2, %v307_v16, %v305_v17  ;;  %vm381_vm2 = vcmp.lt.s32.totalorder %v1221_v6, 1 }
  0xc8   : > { %v313_v20 = vsel %vm311_vm14, %v310_v19, 0.0  ;;  %v314_v21 = vsel %vm312_vm15, %v309_v18, 0.0  ;;  %vm1370_vm14 = vmand %vm254_vm1, %vm290_vm8  ;;  %vm338_vm15 = vcmp.lt.s32.totalorder %v1221_v6, 15 }
  0xc9   : > { %315 = vst [vmem:[#allocation2 + $0x30] sm:$0xf] %v313_v20  ;;  %316 = vst [vmem:[#allocation2 + $0x38] sm:$0xf] %v314_v21 }
  0xca   : > { %v350_v22 = vpop.permute.xlu1 %349  ;;  %v348_v23 = vpop.permute.xlu0 %347  ;;  %vm342_vm8 = vmand %vm255_vm3, %vm291_vm13  ;;  %vm400_vm13 = vcmp.lt.s32.totalorder %v1221_v6, 127 }
  0xcb   : > { %v352_v24 = vsel %vm351_vm10, %v348_v23, %v350_v22  ;;  %v353_v25 = vsel %vm351_vm10, %v350_v22, %v348_v23  ;;  %vm370_vm10 = vcmp.lt.s32.totalorder %v1221_v6, 2 }
  0xcc   : > { %v356_v26 = vsel %vm354_vm12, %v353_v25, 0.0  ;;  %v357_v27 = vsel %vm355_vm0, %v352_v24, 0.0  ;;  %v590_v35 = vld [vmem:[#allocation2 + $0x28] sm:$0xff]  ;;  %v589_v39 = vld [vmem:[#allocation2 + $0x20] sm:$0xff]  ;;  %vm431_vm12 = vcmp.lt.s32.totalorder %v1228_v9, 15  ;;  %vm432_vm0 = vcmp.lt.s32.totalorder %v1232_v11, 15 }
  0xcd   : > { %v360_v28 = vrot.slane %v356_v26, 4  ;;  %v361_v29 = vrot.slane %v357_v27, 4 }
  0xce   : > { %v380_v30 = vpop.permute.xlu1 %379  ;;  %v378_v31 = vpop.permute.xlu0 %377 }
  0xcf   : > { %364 = vst [vmem:[#allocation2 + $0x40] sm:$0xf0] %v360_v28  ;;  %365 = vst [vmem:[#allocation2 + $0x48] sm:$0xf0] %v361_v29  ;;  %v382_v32 = vsel %vm381_vm2, %v378_v31, %v380_v30  ;;  %v383_v33 = vsel %vm381_vm2, %v380_v30, %v378_v31  ;;  %vm428_vm2 = vcmp.lt.s32.totalorder %v1221_v6, 114 }
  0xd0   : > { %v384_v36 = vsel %vm222_vm9, %v383_v33, 0.0  ;;  %v385_v37 = vsel %vm223_vm11, %v382_v32, 0.0  ;;  %v592_v38 = vld [vmem:[#allocation2 + $0x38] sm:$0xff]  ;;  %v591_v40 = vld [vmem:[#allocation2 + $0x30] sm:$0xff] }
  0xd1   : > { %v388_v41 = vrot.slane %v384_v36, 4  ;;  %v389_v42 = vrot.slane %v385_v37, 4  ;;  %v809_v43 = vpack.c.bf16 %v592_v38, %v590_v35  ;;  %v811_v44 = vpack.c.bf16 %v591_v40, %v589_v39 }
  0xd2   : > { %v337_v45 = vpop.permute.xlu1 %336  ;;  %v335_v46 = vpop.permute.xlu0 %334 }
  0xd3   : > { %392 = vst [vmem:[#allocation2 + $0x50] sm:$0xf0] %v388_v41  ;;  %393 = vst [vmem:[#allocation2 + $0x58] sm:$0xf0] %v389_v42  ;;  %v339_v47 = vsel %vm338_vm15, %v335_v46, %v337_v45  ;;  %v340_v48 = vsel %vm338_vm15, %v337_v45, %v335_v46  ;;  %810 = vmatprep.subr.bf16.mxu0 %v809_v43 }
  0xd4   : > { %v343_v49 = vsel %vm1370_vm14, %v340_v48, 0.0  ;;  %v344_v50 = vsel %vm342_vm8, %v339_v47, 0.0  ;;  %812 = vmatpush1.bf16.msra.mxu0 %v811_v44  ;;  %vm1402_vm14 = vmand %vm205_vm4, %vm431_vm12  ;;  %vm417_vm8 = vcmp.lt.s32.totalorder %v1221_v6, 126 }
  0xd5   : > { %345 = vst [vmem:[#allocation2 + $0x40] sm:$0xf] %v343_v49  ;;  %346 = vst [vmem:[#allocation2 + $0x48] sm:$0xf] %v344_v50 }
  0xd6   : > { %v369_v51 = vpop.permute.xlu1 %368  ;;  %v367_v52 = vpop.permute.xlu0 %366  ;;  %vm434_vm15 = vmand %vm206_vm7, %vm432_vm0 }
  0xd7   : > { %v371_v53 = vsel %vm370_vm10, %v367_v52, %v369_v51  ;;  %v372_v54 = vsel %vm370_vm10, %v369_v51, %v367_v52  ;;  %vm462_vm10 = vcmp.lt.s32.totalorder %v1221_v6, 112 }
  0xd8   : > { %v373_v55 = vsel %vm205_vm4, %v372_v54, 0.0  ;;  %v374_v56 = vsel %vm206_vm7, %v371_v53, 0.0 }
  0xd9   : > { %375 = vst [vmem:[#allocation2 + $0x50] sm:$0xf] %v373_v55  ;;  %376 = vst [vmem:[#allocation2 + $0x58] sm:$0xf] %v374_v56 }
  0xda   : > { %v399_v57 = vpop.permute.xlu1 %398  ;;  %v397_v58 = vpop.permute.xlu0 %396 }
  0xdb   : > { %v401_v59 = vsel %vm400_vm13, %v397_v58, %v399_v57  ;;  %v402_v60 = vsel %vm400_vm13, %v399_v57, %v397_v58  ;;  %vm492_vm13 = vcmp.lt.s32.totalorder %v1221_v6, 110 }
  0xdc   : > { %v403_v61 = vsel %vm254_vm1, %v401_v59, 0.0  ;;  %v404_v62 = vsel %vm255_vm3, %v402_v60, 0.0  ;;  %v594_v7 = vld [vmem:[#allocation2 + $0x48] sm:$0xff]  ;;  %v593_v15 = vld [vmem:[#allocation2 + $0x40] sm:$0xff] }
  0xdd   : > { %v407_v0 = vrot.slane %v403_v61, 4  ;;  %v408_v1 = vrot.slane %v404_v62, 4 }
  0xde   : > { %v427_v2 = vpop.permute.xlu1 %426  ;;  %v425_v3 = vpop.permute.xlu0 %424 }
  0xdf   : > { %411 = vst [vmem:[#allocation2 + $0x60] sm:$0xf0] %v407_v0  ;;  %412 = vst [vmem:[#allocation2 + $0x68] sm:$0xf0] %v408_v1  ;;  %v429_v4 = vsel %vm428_vm2, %v425_v3, %v427_v2  ;;  %v430_v5 = vsel %vm428_vm2, %v427_v2, %v425_v3 }
  0xe0   : > { %v435_v12 = vsel %vm1402_vm14, %v429_v4, 0.0  ;;  %v436_v13 = vsel %vm434_vm15, %v430_v5, 0.0  ;;  %v596_v14 = vld [vmem:[#allocation2 + $0x58] sm:$0xff]  ;;  %v595_v16 = vld [vmem:[#allocation2 + $0x50] sm:$0xff]  ;;  %vm1427_vm2 = vmand %vm275_vm5, %vm431_vm12 }
  0xe1   : > { %v439_v17 = vrot.slane %v435_v12, 4  ;;  %v440_v18 = vrot.slane %v436_v13, 4  ;;  %v813_v19 = vpack.c.bf16 %v596_v14, %v594_v7  ;;  %v815_v20 = vpack.c.bf16 %v595_v16, %v593_v15  ;;  %vm1435_vm14 = vmand %vm276_vm6, %vm432_vm0 }
  0xe2   : > { %v416_v21 = vpop.permute.xlu1 %415  ;;  %v414_v22 = vpop.permute.xlu0 %413  ;;  %vm1443_vm15 = vmand %vm222_vm9, %vm431_vm12 }
  0xe3   : > { %443 = vst [vmem:[#allocation2 + $0x70] sm:$0xf0] %v439_v17  ;;  %444 = vst [vmem:[#allocation2 + $0x78] sm:$0xf0] %v440_v18  ;;  %v418_v23 = vsel %vm417_vm8, %v414_v22, %v416_v21  ;;  %v419_v24 = vsel %vm417_vm8, %v416_v21, %v414_v22  ;;  %814 = vmatprep.subr.bf16.mxu0 %v813_v19  ;;  %vm449_vm8 = vcmp.lt.s32.totalorder %v1221_v6, 113 }
  0xe4   : > { %v420_v25 = vsel %vm275_vm5, %v418_v23, 0.0  ;;  %v421_v26 = vsel %vm276_vm6, %v419_v24, 0.0  ;;  %816 = vmatpush1.bf16.msra.mxu0 %v815_v20 }
  0xe5   : > { %422 = vst [vmem:[#allocation2 + $0x70] sm:$0xf] %v420_v25  ;;  %423 = vst [vmem:[#allocation2 + $0x78] sm:$0xf] %v421_v26 }
  0xe6   : > { %v461_v27 = vpop.permute.xlu1 %460  ;;  %v459_v28 = vpop.permute.xlu0 %458  ;;  %v598_v42 = vld [vmem:[#allocation2 + $0x68] sm:$0xff]  ;;  %v597_v46 = vld [vmem:[#allocation2 + $0x60] sm:$0xff] }
  0xe7   : > { %v463_v29 = vsel %vm462_vm10, %v459_v28, %v461_v27  ;;  %v464_v30 = vsel %vm462_vm10, %v461_v27, %v459_v28  ;;  %vm1456_vm10 = vmand %vm223_vm11, %vm432_vm0 }
  0xe8   : > { %v465_v31 = vsel %vm431_vm12, %v463_v29, 0.0  ;;  %v466_v32 = vsel %vm432_vm0, %v464_v30, 0.0 }
  0xe9   : > { %v469_v34 = vrot.slane %v465_v31, 4  ;;  %v470_v35 = vrot.slane %v466_v32, 4 }
  0xea   : > { %v491_v37 = vpop.permute.xlu1 %490  ;;  %v489_v38 = vpop.permute.xlu0 %488 }
  0xeb   : > { %473 = vst [vmem:[#allocation2 + $0x80] sm:$0xf0] %v469_v34  ;;  %474 = vst [vmem:[#allocation2 + $0x88] sm:$0xf0] %v470_v35  ;;  %v493_v39 = vsel %vm492_vm13, %v489_v38, %v491_v37  ;;  %v494_v40 = vsel %vm492_vm13, %v491_v37, %v489_v38  ;;  %vm479_vm13 = vcmp.lt.s32.totalorder %v1221_v6, 111 }
  0xec   : > { %v497_v43 = vsel %vm1427_vm2, %v493_v39, 0.0  ;;  %v498_v44 = vsel %vm1435_vm14, %v494_v40, 0.0  ;;  %v600_v45 = vld [vmem:[#allocation2 + $0x78] sm:$0xff]  ;;  %v599_v47 = vld [vmem:[#allocation2 + $0x70] sm:$0xff]  ;;  %vm482_vm2 = vmand %vm254_vm1, %vm431_vm12 }
  0xed   : > { %v501_v48 = vrot.slane %v497_v43, 4  ;;  %v502_v49 = vrot.slane %v498_v44, 4  ;;  %v817_v51 = vpack.c.bf16 %v600_v45, %v598_v42  ;;  %v819_v52 = vpack.c.bf16 %v599_v47, %v597_v46  ;;  %vm483_vm14 = vmand %vm255_vm3, %vm432_vm0 }
  0xee   : > { %v448_v53 = vpop.permute.xlu1 %447  ;;  %v446_v54 = vpop.permute.xlu0 %445 }
  0xef   : > { %505 = vst [vmem:[#allocation2 + $0x90] sm:$0xf0] %v501_v48  ;;  %506 = vst [vmem:[#allocation2 + $0x98] sm:$0xf0] %v502_v49  ;;  %v450_v55 = vsel %vm449_vm8, %v446_v54, %v448_v53  ;;  %v451_v56 = vsel %vm449_vm8, %v448_v53, %v446_v54  ;;  %818 = vmatprep.subr.bf16.mxu0 %v817_v51  ;;  %vm515_vm8 = vcmp.lt.s32.totalorder %v1232_v11, 14 }
  0xf0   : > { %v454_v57 = vsel %vm1443_vm15, %v450_v55, 0.0  ;;  %v455_v58 = vsel %vm1456_vm10, %v451_v56, 0.0  ;;  %820 = vmatpush1.bf16.msra.mxu0 %v819_v52  ;;  %vm514_vm15 = vcmp.lt.s32.totalorder %v1228_v9, 14  ;;  %vm526_vm10 = vcmp.lt.s32.totalorder %v1221_v6, 97  ;;  %vm530_vm0 = vmand %vm223_vm11, %vm515_vm8  ;;  %v584_v52 = vld [vmem:[%s1587_s1] sm:$0xff] }
  0xf1   : > { %456 = vst [vmem:[#allocation2 + $0x80] sm:$0xf] %v454_v57  ;;  %457 = vst [vmem:[#allocation2 + $0x88] sm:$0xf] %v455_v58 }
  0xf2   : > { %v478_v59 = vpop.permute.xlu1 %477  ;;  %v476_v60 = vpop.permute.xlu0 %475  ;;  %vm529_vm12 = vmand %vm222_vm9, %vm514_vm15 }
  0xf3   : > { %v480_v61 = vsel %vm479_vm13, %v476_v60, %v478_v59  ;;  %v481_v62 = vsel %vm479_vm13, %v478_v59, %v476_v60  ;;  %vm556_vm13 = vcmp.lt.s32.totalorder %v1221_v6, 95  ;;  %vm1489_vm9 = vmand %vm254_vm1, %vm514_vm15 }
  0xf4   : > { %v484_v63 = vsel %vm482_vm2, %v480_v61, 0.0  ;;  %v485_v0 = vsel %vm483_vm14, %v481_v62, 0.0  ;;  %vm1497_vm11 = vmand %vm255_vm3, %vm515_vm8  ;;  %vm511_vm3 = vcmp.lt.s32.totalorder %v1221_v6, 98  ;;  %vm545_vm2 = vcmp.lt.s32.totalorder %v1221_v6, 96 }
  0xf5   : > { %486 = vst [vmem:[#allocation2 + $0x90] sm:$0xf] %v484_v63  ;;  %487 = vst [vmem:[#allocation2 + $0x98] sm:$0xf] %v485_v0 }
  0xf6   : > { %v525_v1 = vpop.permute.xlu1 %524  ;;  %v523_v2 = vpop.permute.xlu0 %522  ;;  %vm1505_vm1 = vmand %vm205_vm4, %vm514_vm15 }
  0xf7   : > { %v527_v3 = vsel %vm526_vm10, %v523_v2, %v525_v1  ;;  %v528_v4 = vsel %vm526_vm10, %v525_v1, %v523_v2  ;;  %vm517_vm4 = vmand %vm206_vm7, %vm515_vm8  ;;  %vm575_vm7 = vcmp.lt.s32.totalorder %v1221_v6, 94 }
  0xf8   : > { %v531_v5 = vsel %vm529_vm12, %v527_v3, 0.0  ;;  %v532_v7 = vsel %vm530_vm0, %v528_v4, 0.0  ;;  %v602_v21 = vld [vmem:[#allocation2 + $0x88] sm:$0xff]  ;;  %v601_v25 = vld [vmem:[#allocation2 + $0x80] sm:$0xff]  ;;  %vm578_vm14 = vmand %vm275_vm5, %vm514_vm15  ;;  %vm621_vm5 = vcmask 1043456  }
  0xf9   : > { %v535_v13 = vrot.slane %v531_v5, 4  ;;  %v536_v14 = vrot.slane %v532_v7, 4  ;;  %vm579_vm10 = vmand %vm276_vm6, %vm515_vm8  ;;  %vm617_vm6 = vcmask 818176  }
  0xfa   : > { %v555_v16 = vpop.permute.xlu1 %554  ;;  %v553_v17 = vpop.permute.xlu0 %552 }
  0xfb   : > { %539 = vst [vmem:[#allocation2 + $0xa0] sm:$0xf0] %v535_v13  ;;  %540 = vst [vmem:[#allocation2 + $0xa8] sm:$0xf0] %v536_v14  ;;  %v557_v18 = vsel %vm556_vm13, %v553_v17, %v555_v16  ;;  %v558_v19 = vsel %vm556_vm13, %v555_v16, %v553_v17 }
  0xfc   : > { %v561_v22 = vsel %vm1489_vm9, %v557_v18, 0.0  ;;  %v562_v23 = vsel %vm1497_vm11, %v558_v19, 0.0  ;;  %v604_v24 = vld [vmem:[#allocation2 + $0x98] sm:$0xff]  ;;  %v603_v26 = vld [vmem:[#allocation2 + $0x90] sm:$0xff] }
  0xfd   : > { %v565_v27 = vrot.slane %v561_v22, 4  ;;  %v566_v28 = vrot.slane %v562_v23, 4  ;;  %v821_v29 = vpack.c.bf16 %v604_v24, %v602_v21  ;;  %v823_v30 = vpack.c.bf16 %v603_v26, %v601_v25 }
  0xfe   : > { %v510_v31 = vpop.permute.xlu1 %509  ;;  %v508_v32 = vpop.permute.xlu0 %507 }
  0xff   : > { %569 = vst [vmem:[#allocation2 + $0xb0] sm:$0xf0] %v565_v27  ;;  %570 = vst [vmem:[#allocation2 + $0xb8] sm:$0xf0] %v566_v28  ;;  %v512_v33 = vsel %vm511_vm3, %v508_v32, %v510_v31  ;;  %v513_v34 = vsel %vm511_vm3, %v510_v31, %v508_v32  ;;  %822 = vmatprep.subr.bf16.mxu0 %v821_v29 }
 0x100   : > { %v518_v35 = vsel %vm1505_vm1, %v512_v33, 0.0  ;;  %v519_v36 = vsel %vm517_vm4, %v513_v34, 0.0  ;;  %824 = vmatpush1.bf16.msra.mxu0 %v823_v30 }
 0x101   : > { %520 = vst [vmem:[#allocation2 + $0xa0] sm:$0xf] %v518_v35  ;;  %521 = vst [vmem:[#allocation2 + $0xa8] sm:$0xf] %v519_v36 }
 0x102   : > { %v544_v37 = vpop.permute.xlu1 %543  ;;  %v542_v38 = vpop.permute.xlu0 %541 }
 0x103   : > { %v546_v39 = vsel %vm545_vm2, %v542_v38, %v544_v37  ;;  %v547_v40 = vsel %vm545_vm2, %v544_v37, %v542_v38 }
 0x104   : > { %v548_v41 = vsel %vm514_vm15, %v546_v39, 0.0  ;;  %v549_v42 = vsel %vm515_vm8, %v547_v40, 0.0 }
 0x105   : > { %550 = vst [vmem:[#allocation2 + $0xb0] sm:$0xf] %v548_v41  ;;  %551 = vst [vmem:[#allocation2 + $0xb8] sm:$0xf] %v549_v42 }
 0x106   : > { %v574_v43 = vpop.permute.xlu1 %573  ;;  %v572_v44 = vpop.permute.xlu0 %571 }
 0x107   : > { %v576_v45 = vsel %vm575_vm7, %v572_v44, %v574_v43  ;;  %v577_v46 = vsel %vm575_vm7, %v574_v43, %v572_v44 }
 0x108   : > { %v580_v47 = vsel %vm578_vm14, %v576_v45, 0.0  ;;  %v581_v48 = vsel %vm579_vm10, %v577_v46, 0.0  ;;  %v606_v6 = vld [vmem:[#allocation2 + $0xa8] sm:$0xff]  ;;  %v605_v8 = vld [vmem:[#allocation2 + $0xa0] sm:$0xff] }
 0x109   : > { %582 = vst [vmem:[#allocation2 + $0xc0] sm:$0xf] %v580_v47  ;;  %583 = vst [vmem:[#allocation2 + $0xc8] sm:$0xf] %v581_v48 }
 0x10c   : > { %v608_v9 = vld [vmem:[#allocation2 + $0xb8] sm:$0xff]  ;;  %v607_v49 = vld [vmem:[#allocation2 + $0xb0] sm:$0xff] }
 0x10d   : > { %v825_v50 = vpack.c.bf16 %v608_v9, %v606_v6  ;;  %v827_v51 = vpack.c.bf16 %v607_v49, %v605_v8 }
 0x10f   : > { %826 = vmatprep.subr.bf16.mxu0 %v825_v50 }
 0x110   : > { %828 = vmatpush1.bf16.msra.mxu0 %v827_v51  ;;  %v610_v10 = vld [vmem:[#allocation2 + $0xc8] sm:$0xf]  ;;  %v609_v11 = vld [vmem:[#allocation2 + $0xc0] sm:$0xf] }
 0x111   : > { %795 = vmatprep.subr.msk.mxu0 %vm621_vm5, %v610_v10 }
 0x114   : > { %796 = vmatpush1.msk.msra.mxu0 %vm621_vm5, %v609_v11 }
 0x115   : > { %797 = vmatmul.mubr.msk.f32.vlgmr.msra.gmra.mrb[0].mxu0 %vm617_vm6, %v584_v52 }
 0x117   : > { %v615_v53 = vpop.permute.xlu0 %614 }
 0x1e8   : > { %v694_v54 = vpop.f32.mrb[0].mxu0 }
 0x1e9   : > { %v695_v55 = vadd.f32 %v694_v54, %v615_v53  ;;  %v696_v56 = vpop.f32.mrb[1].mxu0 }
 0x1ea   : > { %v697_v57 = vadd.f32 %v696_v56, %v615_v53 }
 0x1eb   : > { %699 = vst [vmem:[%s186_s28] sm:$0xff] %v695_v55 }
 0x1ec   : > { %700 = vst [vmem:[%s186_s28 + $0x8] sm:$0xff] %v697_v57 }
 0x1ed   : > { %946 = shalt.err (!%p943_p4)
}
 0x1ee   : > { %s947_s29 = scalar_lea.hbm %s1542_s4, 256  ;;  %s951_s17 = scalar_lea.hbm %s1589_s3, 512 }
 0x1ef   : > { %p948_p5 = scmp.ne.s32.totalorder %s1542_s4, %s947_s29  ;;  %p952_p0 = scmp.lt.u32.totalorder %s1542_s4, %s1589_s3 }
 0x1f0   : > { %p953_p1 = scmp.lt.u32.totalorder %s951_s17, %s947_s29  ;;  %p955_p6 = scmp.lt.u32.totalorder %s947_s29, %s1542_s4 }
 0x1f1   : > { %p949_p8 = pnand %p948_p5, %p1630_p11 }
 0x1f2   : > { %p954_p3 = por %p953_p1, %p952_p0 }
 0x1f3   : > { %p950_p9 = pneg %p949_p8 }
 0x1f4   : > { %p956_p12 = por %p955_p6, %p954_p3 }
 0x1f6   : > { %p957_p13 = pnand %p956_p12, %p950_p9 }
 0x1f8   : > { %960 = shalt.err (!%p957_p13)
}
 0x1f9   : > { %831 = dma.vmem_to_hbm [thread:$0]  (%p1630_p11), %s1544_s30, 256, %s1542_s4, %s702_s6  }
 0x1fa PF: > { %s728_s22 = sand.u32 1, %s987_s12   ;;  %p1631_p7 = scmp.ne.s32.totalorder %s1594_s25, 0 }
 0x1fb   : > { %p1632_p10 = scmp.ge.s32.totalorder %s999_s15, 2  ;;  %s729_s26 = scalar_lea.sflag [#allocation5], %s728_s22 }
 0x1fd   : > { %p838_p2 = pnand %p1632_p10, %p1631_p7 }
 0x1ff   : > { %982 = dma.done.wait (!%p838_p2), %s729_s26, 256  }
 0x200   : > { %984 = vsyncadd (!%p838_p2), %s729_s26, 4294967040  ;;  %p16_p4 = scmp.ge.s32.totalorder %s1074_s18, 4   ;;  %s1633_s12 = smov %s991_s13 }
 0x201   : > { %s1634_s13 = smov %s995_s14  ;;  %s1635_s14 = smov %s1086_s21 }
 0x202   : > { %s1636_s15 = smov %s1074_s18  ;;  %18 = sbr.rel (!%p16_p4) target bundleno = 5 (0x5), region = 77 }
 0x209   :  { %734 = vsyncpa [#allocation4], 1 }
 0x20a   :  { %736 = vsyncpa [#allocation4 + $0x1], 1 }
 0x20b   :  { %737 = vsyncpa [#allocation5], 1 }
 0x20c   :  { %739 = vsyncpa [#allocation5 + $0x1], 1 }

</bundles_post_ra>
